<compile_context>
chip_gen: v7x
topology: tpu7x:2x2x1
jax: 0.10.0
libtpu: 0.0.40
codegen_flags: <defaults>
</compile_context>

<pallas_src>
import math

import jax
import jax.numpy as jnp
from jax import lax
from jax.experimental import pallas as pl
from jax.experimental.pallas import tpu as pltpu


_LANE = 128
_SUBLANE = 8


def _round_up(n, m):
    return ((n + m - 1) // m) * m


def _gelu_exact(x):
    # PyTorch nn.GELU() default: 0.5 * x * (1 + erf(x / sqrt(2)))
    return 0.5 * x * (1.0 + lax.erf(x * (1.0 / math.sqrt(2.0))))


def policy_kernel(x_ref,
                  w1_ref, b1_ref,
                  w2_ref, b2_ref,
                  w3_ref, b3_ref,
                  w4_ref, b4_ref,
                  o_ref):
    mm_dtype = w1_ref.dtype          # bf16 fast path (or f32 exact path)

    x = x_ref[...].astype(mm_dtype)

    # Linear(input_dim, 256) + GELU   (f32 accumulate, f32 elementwise)
    h = jnp.dot(x, w1_ref[...], preferred_element_type=jnp.float32) + b1_ref[...]
    h = _gelu_exact(h)

    # Linear(256, 128) + GELU
    h = jnp.dot(h.astype(mm_dtype), w2_ref[...],
                preferred_element_type=jnp.float32) + b2_ref[...]
    h = _gelu_exact(h)

    # Linear(128, 64 -> 128 padded) + ReLU  (padded lanes stay exactly 0)
    h = jnp.dot(h.astype(mm_dtype), w3_ref[...],
                preferred_element_type=jnp.float32) + b3_ref[...]
    h = jnp.maximum(h, 0.0)

    # Linear(128, out_pad).  Padded logit lanes carry a -1e30 f32 bias.
    logits = jnp.dot(h.astype(mm_dtype), w4_ref[...],
                     preferred_element_type=jnp.float32) + b4_ref[...]

    # Numerically stable softmax over the lane-dense last dim.  Padded
    # lanes: exp(-1e30 - m) == 0, so they contribute no probability mass.
    m = jnp.max(logits, axis=-1, keepdims=True)
    e = jnp.exp(logits - m)
    inv = pl.reciprocal(jnp.sum(e, axis=-1, keepdims=True), approx=True)
    o_ref[...] = (e * inv).astype(o_ref.dtype)


def prepare_policy_params(params, *, matmul_dtype=jnp.bfloat16):
    """One-time parameter prep (padding / reshape / dtype cast), hoisted out
    of the per-call path.  params: [(W, b)] x 4 with W shaped (in, out)."""
    (w1, b1), (w2, b2), (w3, b3), (w4, b4) = params
    h3 = w3.shape[1]                       # 64
    out_dim = w4.shape[1]
    h3_pad = _round_up(h3, _LANE)          # 128
    out_pad = _round_up(out_dim, _LANE)    # e.g. 128

    # Zero-pad the 64-wide layer to 128 lanes; zero cols + zero bias +
    # ReLU(0)=0 keeps padded lanes exactly 0.  Padded logit lanes get a
    # -1e30 bias (kept in f32) so the softmax ignores them.
    w3p = jnp.pad(w3, ((0, 0), (0, h3_pad - h3)))
    b3p = jnp.pad(b3, (0, h3_pad - h3))
    w4p = jnp.pad(w4, ((0, h3_pad - w4.shape[0]), (0, out_pad - out_dim)))
    b4p = jnp.pad(b4, (0, out_pad - out_dim),
                  constant_values=jnp.float32(-1e30))

    return {
        "w1": w1.astype(matmul_dtype), "b1": b1.reshape(1, -1).astype(jnp.float32),
        "w2": w2.astype(matmul_dtype), "b2": b2.reshape(1, -1).astype(jnp.float32),
        "w3": w3p.astype(matmul_dtype), "b3": b3p.reshape(1, -1).astype(jnp.float32),
        "w4": w4p.astype(matmul_dtype), "b4": b4p.reshape(1, -1).astype(jnp.float32),
        "out_dim": out_dim,
    }


def policy_forward(x, prepared, *, max_batch_tile=512):
    """x: (B, input_dim) float32.  prepared: output of prepare_policy_params."""
    B, input_dim = x.shape
    w1, b1 = prepared["w1"], prepared["b1"]
    w2, b2 = prepared["w2"], prepared["b2"]
    w3, b3 = prepared["w3"], prepared["b3"]
    w4, b4 = prepared["w4"], prepared["b4"]
    out_dim = prepared["out_dim"]

    h1 = w1.shape[1]          # 256
    h2 = w2.shape[1]          # 128
    h3p = w3.shape[1]         # 128 (padded 64)
    out_pad = w4.shape[1]     # 128 (padded out_dim)

    # Batch tile: multiple of 8 sublanes.  No batch padding of x — the last
    # grid block may be ragged (OOB rows read garbage, their writes are
    # masked, rows are independent).  When the batch allows, force >= 2 grid
    # steps so the "parallel" batch axis shards across v7x's 2 TensorCores.
    b8 = _round_up(B, _SUBLANE)
    tb = min(max_batch_tile, b8)
    if b8 >= 2 * _SUBLANE:
        tb = min(tb, _round_up(pl.cdiv(B, 2), _SUBLANE))
    grid = pl.cdiv(B, tb)

    def resident(shape):
        # Same block index every grid step -> stays resident in VMEM.
        return pl.BlockSpec(shape, lambda i: (0, 0))

    in_specs = [
        pl.BlockSpec((tb, input_dim), lambda i: (i, 0)),   # x tile (unpadded K)
        resident((input_dim, h1)), resident((1, h1)),
        resident((h1, h2)),        resident((1, h2)),
        resident((h2, h3p)),       resident((1, h3p)),
        resident((h3p, out_pad)),  resident((1, out_pad)),
    ]
    out_spec = pl.BlockSpec((tb, out_pad), lambda i: (i, 0))

    n_rows = grid * tb
    flops = 2 * n_rows * (input_dim * h1 + h1 * h2 + h2 * h3p + h3p * out_pad)
    transcendentals = n_rows * (h1 + h2 + out_pad)
    weight_bytes = sum(int(a.size) * a.dtype.itemsize
                       for a in (w1, b1, w2, b2, w3, b3, w4, b4))
    bytes_accessed = 4 * (n_rows * input_dim + n_rows * out_pad) + weight_bytes

    out_padded = pl.pallas_call(
        policy_kernel,
        out_shape=jax.ShapeDtypeStruct((B, out_pad), jnp.float32),
        grid=(grid,),
        in_specs=in_specs,
        out_specs=out_spec,
        compiler_params=pltpu.CompilerParams(
            dimension_semantics=("parallel",)),
        cost_estimate=pl.CostEstimate(
            flops=int(flops),
            transcendentals=int(transcendentals),
            bytes_accessed=int(bytes_accessed)),
    )(x,
      w1, b1,
      w2, b2,
      w3, b3,
      w4, b4)

    return out_padded[:, :out_dim]


def init_policy_params(key, input_dim, output_dim):
    """Deterministic init mimicking nn.Linear's U(-1/sqrt(fan_in), 1/sqrt(fan_in))."""
    dims = [input_dim, 256, 128, 64, output_dim]
    params = []
    for i in range(4):
        fan_in, fan_out = dims[i], dims[i + 1]
        key, kw, kb = jax.random.split(key, 3)
        bound = 1.0 / math.sqrt(fan_in)
        w = jax.random.uniform(kw, (fan_in, fan_out), jnp.float32, -bound, bound)
        b = jax.random.uniform(kb, (fan_out,), jnp.float32, -bound, bound)
        params.append((w, b))
    return params


def _reference_forward(x, params):
    h = x
    (w1, b1), (w2, b2), (w3, b3), (w4, b4) = params
    h = _gelu_exact(h @ w1 + b1)
    h = _gelu_exact(h @ w2 + b2)
    h = jnp.maximum(h @ w3 + b3, 0.0)
    logits = h @ w4 + b4
    return jax.nn.softmax(logits, axis=-1)


if __name__ == "__main__":
    key = jax.random.PRNGKey(0)
    batch = 8
    input_dim = 32
    output_dim = 8

    key, kx = jax.random.split(key)
    x = jax.random.normal(kx, (batch, input_dim), jnp.float32)
    params = init_policy_params(key, input_dim, output_dim)
    ref = _reference_forward(x, params)

    # Fast path: bf16 MXU inputs, f32 accumulation / elementwise.
    prepared_bf16 = prepare_policy_params(params)            # bf16 weights
    out = jax.block_until_ready(policy_forward(x, prepared_bf16))
    assert out.shape == (batch, output_dim)
    assert jnp.allclose(jnp.sum(out, axis=-1), 1.0, atol=5e-3)
    assert jnp.allclose(out, ref, atol=2e-2, rtol=2e-2)

    # Exact path: f32 matmuls, tighter parity with the PyTorch module.
    prepared_f32 = prepare_policy_params(params, matmul_dtype=jnp.float32)
    out_f32 = jax.block_until_ready(policy_forward(x, prepared_f32))
    assert out_f32.shape == (batch, output_dim)
    assert jnp.allclose(jnp.sum(out_f32, axis=-1), 1.0, atol=5e-3)
    assert jnp.allclose(out_f32, ref, atol=2e-3, rtol=2e-3)

    print("KERNEL_OK")
</pallas_src>

<mosaic_0001>
module attributes {stable_mosaic.version = 11 : i64} {
  func.func @policy_kernel(%arg0: i32, %arg1: memref<8x32xf32, #tpu.memory_space<vmem>>, %arg2: memref<32x256xbf16, #tpu.memory_space<vmem>>, %arg3: memref<1x256xf32, #tpu.memory_space<vmem>>, %arg4: memref<256x128xbf16, #tpu.memory_space<vmem>>, %arg5: memref<1x128xf32, #tpu.memory_space<vmem>>, %arg6: memref<128x128xbf16, #tpu.memory_space<vmem>>, %arg7: memref<1x128xf32, #tpu.memory_space<vmem>>, %arg8: memref<128x128xbf16, #tpu.memory_space<vmem>>, %arg9: memref<1x128xf32, #tpu.memory_space<vmem>>, %arg10: memref<8x128xf32, #tpu.memory_space<vmem>>) attributes {dimension_semantics = [#tpu.dimension_semantics<parallel>], iteration_bounds = array<i64: 1>, scalar_prefetch = 0 : i64, scratch_operands = 0 : i64, tpu.core_type = #tpu.core_type<tc>, window_params = [{transform_indices = @transform_0, window_bounds = array<i64: 8, 32>}, {pipeline_mode = #tpu.pipeline_mode<synchronous>, transform_indices = @transform_1, window_bounds = array<i64: 32, 256>}, {pipeline_mode = #tpu.pipeline_mode<synchronous>, transform_indices = @transform_2, window_bounds = array<i64: 1, 256>}, {pipeline_mode = #tpu.pipeline_mode<synchronous>, transform_indices = @transform_3, window_bounds = array<i64: 256, 128>}, {pipeline_mode = #tpu.pipeline_mode<synchronous>, transform_indices = @transform_4, window_bounds = array<i64: 1, 128>}, {pipeline_mode = #tpu.pipeline_mode<synchronous>, transform_indices = @transform_5, window_bounds = array<i64: 128, 128>}, {pipeline_mode = #tpu.pipeline_mode<synchronous>, transform_indices = @transform_6, window_bounds = array<i64: 1, 128>}, {pipeline_mode = #tpu.pipeline_mode<synchronous>, transform_indices = @transform_7, window_bounds = array<i64: 128, 128>}, {pipeline_mode = #tpu.pipeline_mode<synchronous>, transform_indices = @transform_8, window_bounds = array<i64: 1, 128>}, {transform_indices = @transform_9, window_bounds = array<i64: 8, 128>}]} {
    %c0 = arith.constant 0 : index
    %c0_0 = arith.constant 0 : index
    %0 = vector.load %arg1[%c0, %c0_0] : memref<8x32xf32, #tpu.memory_space<vmem>>, vector<8x32xf32>
    %1 = arith.truncf %0 : vector<8x32xf32> to vector<8x32xbf16>
    %c0_1 = arith.constant 0 : index
    %c0_2 = arith.constant 0 : index
    %2 = vector.load %arg2[%c0_1, %c0_2] : memref<32x256xbf16, #tpu.memory_space<vmem>>, vector<32x256xbf16>
    %cst = arith.constant dense<0.000000e+00> : vector<8x256xf32>
    %3 = tpu.matmul %1, %2, %cst {dimension_numbers = #tpu.dot_dimension_numbers<[1], [0], [0], [1], [0, 0, 1, 1], [], []>} : vector<8x32xbf16>, vector<32x256xbf16>, vector<8x256xf32> -> vector<8x256xf32>
    %c0_3 = arith.constant 0 : index
    %c0_4 = arith.constant 0 : index
    %4 = vector.load %arg3[%c0_3, %c0_4] : memref<1x256xf32, #tpu.memory_space<vmem>>, vector<1x256xf32>
    %5 = vector.broadcast %4 : vector<1x256xf32> to vector<8x256xf32>
    %6 = arith.addf %3, %5 : vector<8x256xf32>
    %cst_5 = arith.constant 5.000000e-01 : f32
    %7 = vector.broadcast %cst_5 : f32 to vector<8x256xf32>
    %8 = arith.mulf %7, %6 : vector<8x256xf32>
    %cst_6 = arith.constant 0.707106769 : f32
    %9 = vector.broadcast %cst_6 : f32 to vector<8x256xf32>
    %10 = arith.mulf %6, %9 : vector<8x256xf32>
    %11 = math.erf %10 : vector<8x256xf32>
    %cst_7 = arith.constant 1.000000e+00 : f32
    %12 = vector.broadcast %cst_7 : f32 to vector<8x256xf32>
    %13 = arith.addf %12, %11 : vector<8x256xf32>
    %14 = arith.mulf %8, %13 : vector<8x256xf32>
    %15 = arith.truncf %14 : vector<8x256xf32> to vector<8x256xbf16>
    %c0_8 = arith.constant 0 : index
    %c0_9 = arith.constant 0 : index
    %16 = vector.load %arg4[%c0_8, %c0_9] : memref<256x128xbf16, #tpu.memory_space<vmem>>, vector<256x128xbf16>
    %cst_10 = arith.constant dense<0.000000e+00> : vector<8x128xf32>
    %17 = tpu.matmul %15, %16, %cst_10 {dimension_numbers = #tpu.dot_dimension_numbers<[1], [0], [0], [1], [0, 0, 1, 1], [], []>} : vector<8x256xbf16>, vector<256x128xbf16>, vector<8x128xf32> -> vector<8x128xf32>
    %c0_11 = arith.constant 0 : index
    %c0_12 = arith.constant 0 : index
    %18 = vector.load %arg5[%c0_11, %c0_12] : memref<1x128xf32, #tpu.memory_space<vmem>>, vector<1x128xf32>
    %19 = vector.broadcast %18 : vector<1x128xf32> to vector<8x128xf32>
    %20 = arith.addf %17, %19 : vector<8x128xf32>
    %cst_13 = arith.constant 5.000000e-01 : f32
    %21 = vector.broadcast %cst_13 : f32 to vector<8x128xf32>
    %22 = arith.mulf %21, %20 : vector<8x128xf32>
    %cst_14 = arith.constant 0.707106769 : f32
    %23 = vector.broadcast %cst_14 : f32 to vector<8x128xf32>
    %24 = arith.mulf %20, %23 : vector<8x128xf32>
    %25 = math.erf %24 : vector<8x128xf32>
    %cst_15 = arith.constant 1.000000e+00 : f32
    %26 = vector.broadcast %cst_15 : f32 to vector<8x128xf32>
    %27 = arith.addf %26, %25 : vector<8x128xf32>
    %28 = arith.mulf %22, %27 : vector<8x128xf32>
    %29 = arith.truncf %28 : vector<8x128xf32> to vector<8x128xbf16>
    %c0_16 = arith.constant 0 : index
    %c0_17 = arith.constant 0 : index
    %30 = vector.load %arg6[%c0_16, %c0_17] : memref<128x128xbf16, #tpu.memory_space<vmem>>, vector<128x128xbf16>
    %cst_18 = arith.constant dense<0.000000e+00> : vector<8x128xf32>
    %31 = tpu.matmul %29, %30, %cst_18 {dimension_numbers = #tpu.dot_dimension_numbers<[1], [0], [0], [1], [0, 0, 1, 1], [], []>} : vector<8x128xbf16>, vector<128x128xbf16>, vector<8x128xf32> -> vector<8x128xf32>
    %c0_19 = arith.constant 0 : index
    %c0_20 = arith.constant 0 : index
    %32 = vector.load %arg7[%c0_19, %c0_20] : memref<1x128xf32, #tpu.memory_space<vmem>>, vector<1x128xf32>
    %33 = vector.broadcast %32 : vector<1x128xf32> to vector<8x128xf32>
    %34 = arith.addf %31, %33 : vector<8x128xf32>
    %cst_21 = arith.constant 0.000000e+00 : f32
    %35 = vector.broadcast %cst_21 : f32 to vector<8x128xf32>
    %36 = arith.maximumf %34, %35 : vector<8x128xf32>
    %37 = arith.truncf %36 : vector<8x128xf32> to vector<8x128xbf16>
    %c0_22 = arith.constant 0 : index
    %c0_23 = arith.constant 0 : index
    %38 = vector.load %arg8[%c0_22, %c0_23] : memref<128x128xbf16, #tpu.memory_space<vmem>>, vector<128x128xbf16>
    %cst_24 = arith.constant dense<0.000000e+00> : vector<8x128xf32>
    %39 = tpu.matmul %37, %38, %cst_24 {dimension_numbers = #tpu.dot_dimension_numbers<[1], [0], [0], [1], [0, 0, 1, 1], [], []>} : vector<8x128xbf16>, vector<128x128xbf16>, vector<8x128xf32> -> vector<8x128xf32>
    %c0_25 = arith.constant 0 : index
    %c0_26 = arith.constant 0 : index
    %40 = vector.load %arg9[%c0_25, %c0_26] : memref<1x128xf32, #tpu.memory_space<vmem>>, vector<1x128xf32>
    %41 = vector.broadcast %40 : vector<1x128xf32> to vector<8x128xf32>
    %42 = arith.addf %39, %41 : vector<8x128xf32>
    %cst_27 = arith.constant dense<0xFF800000> : vector<8xf32>
    %43 = vector.multi_reduction <maximumf>, %42, %cst_27 [1] : vector<8x128xf32> to vector<8xf32>
    %44 = vector.shape_cast %43 : vector<8xf32> to vector<8x1xf32>
    %45 = vector.broadcast %44 : vector<8x1xf32> to vector<8x128xf32>
    %46 = arith.subf %42, %45 : vector<8x128xf32>
    %47 = math.exp %46 : vector<8x128xf32>
    %cst_28 = arith.constant dense<0.000000e+00> : vector<8xf32>
    %48 = vector.multi_reduction <add>, %47, %cst_28 [1] : vector<8x128xf32> to vector<8xf32>
    %49 = vector.shape_cast %48 : vector<8xf32> to vector<8x1xf32>
    %50 = tpu.reciprocal %49 {approx = true} : vector<8x1xf32> -> vector<8x1xf32>
    %51 = vector.broadcast %50 : vector<8x1xf32> to vector<8x128xf32>
    %52 = arith.mulf %47, %51 : vector<8x128xf32>
    %c0_29 = arith.constant 0 : index
    %c0_30 = arith.constant 0 : index
    %53 = vector.load %arg10[%c0_29, %c0_30] : memref<8x128xf32, #tpu.memory_space<vmem>>, vector<8x128xf32>
    tpu.vector_store %arg10[%c0_29, %c0_30], %52 {strides = array<i32>} : memref<8x128xf32, #tpu.memory_space<vmem>>, vector<8x128xf32>,
    return
  }
  func.func @transform_0(%arg0: i32) -> (i32, i32) {
    %c0_i32 = arith.constant 0 : i32
    %c0_i32_0 = arith.constant 0 : i32
    return %arg0, %c0_i32 : i32, i32
  }
  func.func @transform_1(%arg0: i32) -> (i32, i32) {
    %c0_i32 = arith.constant 0 : i32
    %c0_i32_0 = arith.constant 0 : i32
    %c0_i32_1 = arith.constant 0 : i32
    return %c0_i32, %c0_i32_0 : i32, i32
  }
  func.func @transform_2(%arg0: i32) -> (i32, i32) {
    %c0_i32 = arith.constant 0 : i32
    %c0_i32_0 = arith.constant 0 : i32
    %c0_i32_1 = arith.constant 0 : i32
    return %c0_i32, %c0_i32_0 : i32, i32
  }
  func.func @transform_3(%arg0: i32) -> (i32, i32) {
    %c0_i32 = arith.constant 0 : i32
    %c0_i32_0 = arith.constant 0 : i32
    %c0_i32_1 = arith.constant 0 : i32
    return %c0_i32, %c0_i32_0 : i32, i32
  }
  func.func @transform_4(%arg0: i32) -> (i32, i32) {
    %c0_i32 = arith.constant 0 : i32
    %c0_i32_0 = arith.constant 0 : i32
    %c0_i32_1 = arith.constant 0 : i32
    return %c0_i32, %c0_i32_0 : i32, i32
  }
  func.func @transform_5(%arg0: i32) -> (i32, i32) {
    %c0_i32 = arith.constant 0 : i32
    %c0_i32_0 = arith.constant 0 : i32
    %c0_i32_1 = arith.constant 0 : i32
    return %c0_i32, %c0_i32_0 : i32, i32
  }
  func.func @transform_6(%arg0: i32) -> (i32, i32) {
    %c0_i32 = arith.constant 0 : i32
    %c0_i32_0 = arith.constant 0 : i32
    %c0_i32_1 = arith.constant 0 : i32
    return %c0_i32, %c0_i32_0 : i32, i32
  }
  func.func @transform_7(%arg0: i32) -> (i32, i32) {
    %c0_i32 = arith.constant 0 : i32
    %c0_i32_0 = arith.constant 0 : i32
    %c0_i32_1 = arith.constant 0 : i32
    return %c0_i32, %c0_i32_0 : i32, i32
  }
  func.func @transform_8(%arg0: i32) -> (i32, i32) {
    %c0_i32 = arith.constant 0 : i32
    %c0_i32_0 = arith.constant 0 : i32
    %c0_i32_1 = arith.constant 0 : i32
    return %c0_i32, %c0_i32_0 : i32, i32
  }
  func.func @transform_9(%arg0: i32) -> (i32, i32) {
    %c0_i32 = arith.constant 0 : i32
    %c0_i32_0 = arith.constant 0 : i32
    return %arg0, %c0_i32 : i32, i32
  }
}

</mosaic_0001>

<bundles_post_ra>
// kernel: tpu_custom_call.1
= control target key start
LH: loop header
LB: loop body
LE: loop exit
PB: predicated region body
PF: predicated region fallthrough
CT: control target
= control target key end

     0   :  { %14 = vsyncpa [#allocation3], 0  ;;  %s1122_s0 = inlined_call_operand.hbm [shape: f32[8,32], index: 0, kind: input, shape index: {}]   ;;  %s1123_s1 = inlined_call_operand.hbm [shape: bf16[32,256], index: 1, kind: input, shape index: {}]   ;;  %s1124_s2 = inlined_call_operand.vmem [shape: f32[1,256], index: 2, kind: input, shape index: {}]   ;;  %s1125_s3 = inlined_call_operand.hbm [shape: bf16[256,128], index: 3, kind: input, shape index: {}]   ;;  %s1126_s4 = inlined_call_operand.vmem [shape: f32[1,128], index: 4, kind: input, shape index: {}]   ;;  %s1127_s5 = inlined_call_operand.hbm [shape: bf16[128,128], index: 5, kind: input, shape index: {}]   ;;  %s1128_s6 = inlined_call_operand.vmem [shape: f32[1,128], index: 6, kind: input, shape index: {}]   ;;  %s1129_s7 = inlined_call_operand.hbm [shape: bf16[128,128], index: 7, kind: input, shape index: {}]   ;;  %s1130_s8 = inlined_call_operand.vmem [shape: f32[1,128], index: 8, kind: input, shape index: {}]   ;;  %s1131_s9 = inlined_call_operand.hbm [shape: f32[8,128], index: 9, kind: output, shape index: {}]  }
   0x1   :  { %15 = vsyncpa [#allocation6], 0 }
   0x2   :  { %16 = vsyncpa [#allocation9], 0 }
   0x3   :  { %17 = vsyncpa [#allocation4], 0  ;;  %s948_s30 = smov [#allocation5]   ;;  %s808_s13 = scalar_lea.hbm %s1123_s1, 512 }
   0x4   :  { %s33_s10 = sshll.u32 %s948_s30, 4  ;;  %p809_p0 = scmp.ne.s32.totalorder %s1123_s1, %s808_s13  ;;  %s34_s10 = int_to_ptr.vmem [resolvable:$true] %s33_s10 }
   0x5   :  { %p812_p1 = scmp.lt.u32.totalorder %s808_s13, %s1123_s1 }
   0x7   :  { %p814_p2 = pnand %p812_p1, %p809_p0 }
   0x9   :  { %817 = shalt.err (!%p814_p2)
}
   0xa   :  { %s818_s18 = scalar_lea.vmem %s34_s10, 512  ;;  %p823_p4 = scmp.lt.s32.totalorder %s34_s10, %s34_s10 }
   0xb   :  { %p819_p3 = scmp.ne.s32.totalorder %s34_s10, %s818_s18  ;;  %p824_p5 = scmp.lt.s32.totalorder %s818_s18, %s818_s18 }
   0xd   :  { %p825_p6 = por %p824_p5, %p823_p4 }
   0xf   :  { %p826_p7 = pnand %p825_p6, %p819_p3 }
  0x11   :  { %829 = shalt.err (!%p826_p7)
}
  0x12   :  { %s949_s19 = smov 128   ;;  %s950_s20 = smov 8  }
  0x13   :  { %39 = dma.hbm_to_vmem [thread:$0]  %s1123_s1, 512, %s34_s10, [#allocation6], %s949_s19, %s949_s19, %s950_s20  }
  0x14   :  { %s951_s23 = smov [#allocation8]   ;;  %s952_s25 = smov [#allocation2]  }
  0x15   :  { %s61_s24 = sshll.u32 %s951_s23, 4  ;;  %s24_s26 = sshll.u32 %s952_s25, 4  ;;  %s62_s24 = int_to_ptr.vmem [resolvable:$true] %s61_s24  ;;  %s25_s26 = int_to_ptr.vmem [resolvable:$true] %s24_s26 }
  0x16   :  { %s830_s29 = scalar_lea.hbm %s1127_s5, 1024 }
  0x17   :  { %p831_p8 = scmp.ne.s32.totalorder %s1127_s5, %s830_s29  ;;  %p834_p9 = scmp.lt.u32.totalorder %s830_s29, %s1127_s5 }
  0x19   :  { %p836_p10 = pnand %p834_p9, %p831_p8 }
  0x1b   :  { %839 = shalt.err (!%p836_p10)
}
  0x1c   :  { %s840_s1 = scalar_lea.vmem %s62_s24, 1024  ;;  %p845_p12 = scmp.lt.s32.totalorder %s62_s24, %s62_s24 }
  0x1d   :  { %p841_p11 = scmp.ne.s32.totalorder %s62_s24, %s840_s1  ;;  %p846_p13 = scmp.lt.s32.totalorder %s840_s1, %s840_s1 }
  0x1f   :  { %p847_p0 = por %p846_p13, %p845_p12 }
  0x21   :  { %p848_p1 = pnand %p847_p0, %p841_p11 }
  0x23   :  { %851 = shalt.err (!%p848_p1)
}
  0x24   :  { %s953_s10 = smov 64   ;;  %s954_s14 = smov 4  }
  0x25   :  { %67 = dma.hbm_to_vmem [thread:$0]  %s1127_s5, 1024, %s62_s24, [#allocation9], %s953_s10, %s953_s10, %s954_s14  }
  0x26   :  { %s852_s19 = scalar_lea.hbm %s1122_s0, 128 }
  0x27   :  { %p853_p2 = scmp.ne.s32.totalorder %s1122_s0, %s852_s19  ;;  %p856_p3 = scmp.lt.u32.totalorder %s852_s19, %s1122_s0 }
  0x29   :  { %p858_p4 = pnand %p856_p3, %p853_p2 }
  0x2b   :  { %861 = shalt.err (!%p858_p4)
}
  0x2c   :  { %s862_s25 = scalar_lea.vmem %s25_s26, 128  ;;  %p867_p6 = scmp.lt.s32.totalorder %s25_s26, %s25_s26 }
  0x2d   :  { %p863_p5 = scmp.ne.s32.totalorder %s25_s26, %s862_s25  ;;  %p868_p7 = scmp.lt.s32.totalorder %s862_s25, %s862_s25 }
  0x2f   :  { %p869_p8 = por %p868_p7, %p867_p6 }
  0x31   :  { %p870_p9 = pnand %p869_p8, %p863_p5 }
  0x33   :  { %873 = shalt.err (!%p870_p9)
}
  0x34   :  { %27 = dma.hbm_to_vmem [thread:$0]  %s1122_s0, 128, %s25_s26, [#allocation3]  }
  0x35   :  { %s955_s27 = smov [#allocation7]   ;;  %s956_s29 = smov [#allocation10]  }
  0x36   :  { %s47_s28 = sshll.u32 %s955_s27, 4  ;;  %s75_s30 = sshll.u32 %s956_s29, 4  ;;  %s48_s28 = int_to_ptr.vmem [resolvable:$true] %s47_s28  ;;  %s76_s30 = int_to_ptr.vmem [resolvable:$true] %s75_s30 }
  0x37   :  { %s874_s13 = scalar_lea.hbm %s1125_s3, 2048 }
  0x38   :  { %p875_p10 = scmp.ne.s32.totalorder %s1125_s3, %s874_s13  ;;  %p878_p11 = scmp.lt.u32.totalorder %s874_s13, %s1125_s3 }
  0x3a   :  { %p880_p12 = pnand %p878_p11, %p875_p10 }
  0x3c   :  { %883 = shalt.err (!%p880_p12)
}
  0x3d   :  { %s884_s0 = scalar_lea.vmem %s48_s28, 2048  ;;  %p889_p0 = scmp.lt.s32.totalorder %s48_s28, %s48_s28 }
  0x3e   :  { %p885_p13 = scmp.ne.s32.totalorder %s48_s28, %s884_s0  ;;  %p890_p1 = scmp.lt.s32.totalorder %s884_s0, %s884_s0 }
  0x40   :  { %p891_p2 = por %p890_p1, %p889_p0 }
  0x42   :  { %p892_p3 = pnand %p891_p2, %p885_p13 }
  0x44   :  { %895 = shalt.err (!%p892_p3)
}
  0x45   :  { %53 = dma.hbm_to_vmem [thread:$0]  %s1125_s3, 2048, %s48_s28, [#allocation6], %s953_s10, %s953_s10, %s954_s14  }
  0x46   :  { %s896_s21 = scalar_lea.hbm %s1129_s7, 1024 }
  0x47   :  { %p897_p4 = scmp.ne.s32.totalorder %s1129_s7, %s896_s21  ;;  %p900_p5 = scmp.lt.u32.totalorder %s896_s21, %s1129_s7 }
  0x49   :  { %p902_p6 = pnand %p900_p5, %p897_p4 }
  0x4b   :  { %905 = shalt.err (!%p902_p6)
}
  0x4c   :  { %s906_s24 = scalar_lea.vmem %s76_s30, 1024  ;;  %p911_p8 = scmp.lt.s32.totalorder %s76_s30, %s76_s30 }
  0x4d   :  { %p907_p7 = scmp.ne.s32.totalorder %s76_s30, %s906_s24  ;;  %p912_p9 = scmp.lt.s32.totalorder %s906_s24, %s906_s24 }
  0x4f   :  { %p913_p10 = por %p912_p9, %p911_p8 }
  0x51   :  { %p914_p11 = pnand %p913_p10, %p907_p7 }
  0x53   :  { %917 = shalt.err (!%p914_p11)
}
  0x54   :  { %81 = dma.hbm_to_vmem [thread:$0]  %s1129_s7, 1024, %s76_s30, [#allocation9], %s953_s10, %s953_s10, %s954_s14  }
  0x55   :  { %940 = dma.done.wait [#allocation3], 128  }
  0x56   :  { %941 = vsyncadd [#allocation3], 4294967168 }
  0x57   :  { %942 = dma.done.wait [#allocation6], 2560  }
  0x58   :  { %943 = vsyncadd [#allocation6], 4294964736 }
  0x59   :  { %944 = dma.done.wait [#allocation9], 2048  }
  0x5a   :  { %945 = vsyncadd [#allocation9], 4294965248  ;;  %v957_v0 = vmov 0   ;;  %v760_v1 = vld [vmem:[#allocation5 + $0x4] ss:$8 sps:$4 sm:$0xff]   ;;  %v100_v5 = vld [vmem:[#allocation2] sm:$0xff]  ;;  %v108_v26 = vlaneseq }
  0x5b   :  { %174 = vmatprep.mubr.bf16.mxu0 %v957_v0  ;;  %v762_v2 = vld [vmem:[#allocation5] ss:$8 sps:$4 sm:$0xff]   ;;  %142 = vmatprep.subr.bf16.mxu0 %v760_v1  ;;  %v763_v3 = vld [vmem:[#allocation5 + $0x14] ss:$8 sps:$4 sm:$0xff]   ;;  %v765_v4 = vld [vmem:[#allocation5 + $0x10] ss:$8 sps:$4 sm:$0xff]   ;;  %v101_v9 = vpack.c.bf16 %v100_v5, %v100_v5 }
  0x5c   :  { %143 = vmatpush1.bf16.msra.mxu0 %v762_v2  ;;  %v766_v6 = vld [vmem:[#allocation7 + $0x40] sm:$0xff]   ;;  %v768_v8 = vld [vmem:[#allocation7 + $0x48] sm:$0xff]   ;;  %vm138_vm0 = vcmask 261120   ;;  %v770_v11 = vld [vmem:[#allocation7 + $0x50] sm:$0xff]   ;;  %v958_v24 = vmov 0.0   ;;  %v109_v27 = vshrl.u32 %v108_v26, 7 }
  0x5d   :  { %144 = vmatprep.subr.bf16.mxu0 %v763_v3  ;;  %v767_v7 = vld [vmem:[#allocation7] sm:$0xff]   ;;  %667 = vmatprep.subr.bf16.mxu1 %v766_v6  ;;  %v769_v10 = vld [vmem:[#allocation7 + $0x8] sm:$0xff]   ;;  %v771_v12 = vld [vmem:[#allocation7 + $0x10] sm:$0xff]   ;;  %vm959_vm1 = vmmov 0  }
  0x5e   :  { %668 = vmatpush3.bf16.msra.mxu1 %v767_v7  ;;  %v772_v13 = vld [vmem:[#allocation7 + $0x58] sm:$0xff]   ;;  %v774_v15 = vld [vmem:[#allocation7 + $0x60] sm:$0xff]   ;;  %v776_v17 = vld [vmem:[#allocation7 + $0x68] sm:$0xff]   ;;  %v110_v28 = vsub.s32 0, %v109_v27  ;;  %v114_v30 = vsub.s32 1, %v109_v27 }
  0x5f   :  { %669 = vmatprep.subr.bf16.mxu1 %v768_v8  ;;  %v773_v14 = vld [vmem:[#allocation7 + $0x18] sm:$0xff]   ;;  %v775_v16 = vld [vmem:[#allocation7 + $0x20] sm:$0xff]   ;;  %v777_v18 = vld [vmem:[#allocation7 + $0x28] sm:$0xff]  }
  0x60   :  { %145 = vmatpush1.bf16.msra.mxu0 %v765_v4  ;;  %v778_v19 = vld [vmem:[#allocation7 + $0x70] sm:$0xff]   ;;  %v780_v21 = vld [vmem:[#allocation7 + $0x78] sm:$0xff]   ;;  %v782_v23 = vld [vmem:[#allocation8] sm:$0xff]  }
  0x61   :  { %v779_v20 = vld [vmem:[#allocation7 + $0x30] sm:$0xff]   ;;  %v781_v22 = vld [vmem:[#allocation7 + $0x38] sm:$0xff]   ;;  %707 = vmatprep.subr.bf16.mxu0 %v958_v24  ;;  %v783_v25 = vld [vmem:[#allocation8 + $0x8] sm:$0xff]  }
  0x62   :  { %670 = vmatpush3.bf16.msra.mxu1 %v769_v10  ;;  %v106_v29 = vld [vmem:[%s1124_s2] sm:$0x3]  ;;  %v784_v51 = vld [vmem:[#allocation8 + $0x10] sm:$0xff]   ;;  %v786_v53 = vld [vmem:[#allocation8 + $0x20] sm:$0xff]  }
  0x63   :  { %631 = vmatmul.mubr.msk.bf16.vlgmr.msra.gmra.mrb[0].mxu0 %vm138_vm0, %v101_v9  ;;  %671 = vmatprep.subr.bf16.mxu1 %v770_v11  ;;  %v111_v31 = vrot.slane %v106_v29, %v110_v28  ;;  %v115_v32 = vrot.slane %v106_v29, %v114_v30  ;;  %v785_v52 = vld [vmem:[#allocation8 + $0x18] sm:$0xff]   ;;  %v787_v54 = vld [vmem:[#allocation8 + $0x28] sm:$0xff]   ;;  %v788_v55 = vld [vmem:[#allocation8 + $0x30] sm:$0xff]  }
  0x64   :  { %708 = vmatpush3.bf16.msra.mxu0 %v782_v23  ;;  %v789_v56 = vld [vmem:[#allocation8 + $0x38] sm:$0xff]   ;;  %723 = vmatprep.mubr.msk.bf16.mxu0 %vm959_vm1, %v958_v24  ;;  %v790_v57 = vld [vmem:[#allocation10] sm:$0xff]   ;;  %v791_v58 = vld [vmem:[#allocation10 + $0x8] sm:$0xff]  }
  0x65   :  { %709 = vmatprep.subr.bf16.mxu0 %v958_v24  ;;  %v792_v59 = vld [vmem:[#allocation10 + $0x10] sm:$0xff]   ;;  %v793_v60 = vld [vmem:[#allocation10 + $0x18] sm:$0xff]   ;;  %v794_v61 = vld [vmem:[#allocation10 + $0x20] sm:$0xff]  }
  0x66   :  { %672 = vmatpush3.bf16.msra.mxu1 %v771_v12  ;;  %v795_v62 = vld [vmem:[#allocation10 + $0x28] sm:$0xff]   ;;  %v632_v0 = vld [vmem:[%s1126_s4] ss:$0 sm:$0xff]  ;;  %v796_v12 = vld [vmem:[#allocation10 + $0x30] sm:$0xff]  }
  0x67   :  { %673 = vmatprep.subr.bf16.mxu1 %v772_v13  ;;  %v797_v13 = vld [vmem:[#allocation10 + $0x38] sm:$0xff]  }
  0x68   :  { %710 = vmatpush3.bf16.msra.mxu0 %v783_v25 }
  0x69   :  { %711 = vmatprep.subr.bf16.mxu0 %v958_v24 }
  0x6a   :  { %674 = vmatpush3.bf16.msra.mxu1 %v773_v14  ;;  %v649_v14 = vld [vmem:[%s1128_s6] ss:$0 sm:$0xff]  ;;  %s960_s6 = smov [#allocation11]  }
  0x6b   :  { %675 = vmatprep.subr.bf16.mxu1 %v774_v15  ;;  %s616_s11 = sshll.u32 %s960_s6, 4  ;;  %s617_s11 = int_to_ptr.vmem [resolvable:$true] %s616_s11 }
  0x6c   :  { %712 = vmatpush3.bf16.msra.mxu0 %v784_v51  ;;  %p923_p13 = scmp.lt.s32.totalorder %s617_s11, %s617_s11 }
  0x6d   :  { %713 = vmatprep.subr.bf16.mxu0 %v958_v24 }
  0x6e   :  { %676 = vmatpush3.bf16.msra.mxu1 %v775_v16 }
  0x6f   :  { %677 = vmatprep.subr.bf16.mxu1 %v776_v17 }
  0x70   :  { %714 = vmatpush3.bf16.msra.mxu0 %v785_v52 }
  0x71   :  { %715 = vmatprep.subr.bf16.mxu0 %v958_v24 }
  0x72   :  { %678 = vmatpush3.bf16.msra.mxu1 %v777_v18 }
  0x73   :  { %679 = vmatprep.subr.bf16.mxu1 %v778_v19 }
  0x74   :  { %716 = vmatpush3.bf16.msra.mxu0 %v786_v53 }
  0x75   :  { %717 = vmatprep.subr.bf16.mxu0 %v958_v24 }
  0x76   :  { %680 = vmatpush3.bf16.msra.mxu1 %v779_v20 }
  0x77   :  { %681 = vmatprep.subr.bf16.mxu1 %v780_v21 }
  0x78   :  { %718 = vmatpush3.bf16.msra.mxu0 %v787_v54 }
  0x79   :  { %719 = vmatprep.subr.bf16.mxu0 %v958_v24 }
  0x7a   :  { %682 = vmatpush3.bf16.msra.mxu1 %v781_v22  ;;  %v658_v22 = vld [vmem:[%s1130_s8] ss:$0 sm:$0xff]  ;;  %s918_s8 = scalar_lea.vmem %s617_s11, 128 }
  0x7b   :  { %727 = vmatprep.subr.bf16.mxu1 %v958_v24  ;;  %p919_p12 = scmp.ne.s32.totalorder %s617_s11, %s918_s8  ;;  %p924_p0 = scmp.lt.s32.totalorder %s918_s8, %s918_s8 }
  0x7c   :  { %720 = vmatpush3.bf16.msra.mxu0 %v788_v55 }
  0x7d   :  { %721 = vmatprep.subr.bf16.mxu0 %v958_v24  ;;  %p925_p1 = por %p924_p0, %p923_p13 }
  0x7f   :  { %p926_p2 = pnand %p925_p1, %p919_p12 }
  0x80   :  { %722 = vmatpush3.bf16.msra.mxu0 %v789_v56 }
 0x136   :  { %v176_v33 = vpop.f32.mrb[0].mxu0 }
 0x137   :  { %v177_v34 = vadd.f32 %v176_v33, %v111_v31  ;;  %v178_v35 = vpop.f32.mrb[1].mxu0 }
 0x138   :  { %v179_v36 = vadd.f32 %v178_v35, %v115_v32  ;;  %v180_v37 = vpop.f32.mrb[2].mxu0 }
 0x139   :  { %v185_v38 = vmul.f32 0.70710677, %v177_v34  ;;  %v181_v39 = vpop.f32.mrb[3].mxu0  ;;  %v183_v43 = vmul.f32 0.5, %v177_v34 }
 0x13a   :  { %v186_v40 = vmul.f32 0.70710677, %v179_v36  ;;  %v184_v45 = vmul.f32 0.5, %v179_v36 }
 0x13b   :  { %798 = verf.f32 %v185_v38 }
 0x13c   :  { %800 = verf.f32 %v186_v40 }
 0x145   :  { %v799_v41 = vpop.eup %798 }
 0x146   :  { %v801_v42 = vpop.eup %800  ;;  %v189_v44 = vadd.f32 1.0, %v799_v41 }
 0x147   :  { %v190_v46 = vadd.f32 1.0, %v801_v42 }
 0x148   :  { %v191_v47 = vmul.f32 %v189_v44, %v183_v43 }
 0x149   :  { %v192_v48 = vmul.f32 %v190_v46, %v184_v45 }
 0x14a   :  { %v193_v50 = vpack.c.bf16 %v191_v47, %v191_v47 }
 0x14b   :  { %v194_v49 = vpack.c.bf16 %v192_v48, %v192_v48 }
 0x14d   :  { %362 = vmatprep.mubr.bf16.mxu1 %v194_v49 }
 0x14e   :  { %363 = vmatmul.mubr.bf16.vlgmr.msra.gmra.mrb[0].mxu1 %v193_v50 }
 0x14f   :  { %743 = vmatprep.mubr.msk.bf16.mxu1 %vm959_vm1, %v958_v24  ;;  %728 = vmatpush3.bf16.msra.mxu1 %v790_v57 }
 0x150   :  { %729 = vmatprep.subr.bf16.mxu1 %v958_v24 }
 0x153   :  { %730 = vmatpush3.bf16.msra.mxu1 %v791_v58 }
 0x154   :  { %731 = vmatprep.subr.bf16.mxu1 %v958_v24 }
 0x157   :  { %732 = vmatpush3.bf16.msra.mxu1 %v792_v59 }
 0x158   :  { %733 = vmatprep.subr.bf16.mxu1 %v958_v24 }
 0x15b   :  { %734 = vmatpush3.bf16.msra.mxu1 %v793_v60 }
 0x15c   :  { %735 = vmatprep.subr.bf16.mxu1 %v958_v24 }
 0x15f   :  { %736 = vmatpush3.bf16.msra.mxu1 %v794_v61 }
 0x160   :  { %737 = vmatprep.subr.bf16.mxu1 %v958_v24 }
 0x163   :  { %738 = vmatpush3.bf16.msra.mxu1 %v795_v62 }
 0x164   :  { %739 = vmatprep.subr.bf16.mxu1 %v958_v24 }
 0x167   :  { %740 = vmatpush3.bf16.msra.mxu1 %v796_v12 }
 0x168   :  { %741 = vmatprep.subr.bf16.mxu1 %v958_v24 }
 0x16b   :  { %742 = vmatpush3.bf16.msra.mxu1 %v797_v13 }
 0x221   :  { %v683_v63 = vpop.f32.mrb[0].mxu1 }
 0x222   :  { %v684_v1 = vpop.f32.mrb[1].mxu1 }
 0x223   :  { %v685_v2 = vadd.f32 %v684_v1, %v683_v63  ;;  %v686_v3 = vpop.f32.mrb[2].mxu1 }
 0x224   :  { %v687_v4 = vpop.f32.mrb[3].mxu1 }
 0x225   :  { %v365_v5 = vadd.f32 %v685_v2, %v632_v0 }
 0x227   :  { %v371_v6 = vmul.f32 0.70710677, %v365_v5  ;;  %v370_v8 = vmul.f32 0.5, %v365_v5 }
 0x229   :  { %802 = verf.f32 %v371_v6 }
 0x233   :  { %v803_v7 = vpop.eup %802 }
 0x234   :  { %v373_v9 = vadd.f32 1.0, %v803_v7 }
 0x236   :  { %v374_v10 = vmul.f32 %v373_v9, %v370_v8 }
 0x238   :  { %v375_v11 = vpack.c.bf16 %v374_v10, %v374_v10 }
 0x23a   :  { %724 = vmatmul.mubr.bf16.vlgmr.msra.gmra.mrb[4].mxu0 %v375_v11 }
 0x30d   :  { %v481_v15 = vpop.f32.mrb[4].mxu0 }
 0x30e   :  { %v482_v16 = vadd.f32 %v649_v14, %v481_v15  ;;  %v725_v17 = vpop.f32.mrb[5].mxu0 }
 0x30f   :  { %v484_v18 = vpop.f32.mrb[6].mxu0 }
 0x310   :  { %v487_v19 = vmax.f32 %v482_v16, 0.0  ;;  %v726_v20 = vpop.f32.mrb[7].mxu0 }
 0x312   :  { %v488_v21 = vpack.c.bf16 %v487_v19, %v487_v19 }
 0x314   :  { %744 = vmatmul.mubr.bf16.vlgmr.msra.gmra.mrb[4].mxu1 %v488_v21 }
 0x3e7   :  { %v594_v23 = vpop.f32.mrb[4].mxu1 }
 0x3e8   :  { %v595_v24 = vadd.f32 %v658_v22, %v594_v23  ;;  %v745_v25 = vpop.f32.mrb[5].mxu1 }
 0x3e9   :  { %v597_v26 = vpop.f32.mrb[6].mxu1 }
 0x3ea   :  { %600 = vmax.xlane.f32.xlu0 %v595_v24  ;;  %v746_v27 = vpop.f32.mrb[7].mxu1 }
 0x477   :  { %v601_v28 = vpop.xlane.xlu0 %600 }
 0x478   :  { %v602_v29 = vsub.f32 %v595_v24, %v601_v28 }
 0x47a   :  { %v603_v30 = vmul.f32 1.442695, %v602_v29 }
 0x47c   :  { %804 = vpow2.f32 %v603_v30 }
 0x486   :  { %v805_v31 = vpop.eup %804 }
 0x487   :  { %605 = vadd.xlane.f32.xlu0 %v805_v31 }
 0x514   :  { %v606_v32 = vpop.xlane.xlu0 %605 }
 0x515   :  { %806 = vrcp.f32 %v606_v32 }
 0x51f   :  { %v807_v33 = vpop.eup %806 }
 0x520   :  { %v608_v34 = vmul.f32 %v807_v33, %v805_v31 }
 0x522   :  { %609 = vst [vmem:[#allocation11] sm:$0xff] %v608_v34 }
 0x523   :  { %929 = shalt.err (!%p926_p2)
}
 0x524   :  { %s930_s1 = scalar_lea.hbm %s1131_s9, 128 }
 0x525   :  { %p931_p3 = scmp.ne.s32.totalorder %s1131_s9, %s930_s1  ;;  %p934_p4 = scmp.lt.u32.totalorder %s930_s1, %s1131_s9 }
 0x527   :  { %p936_p5 = pnand %p934_p4, %p931_p3 }
 0x529   :  { %939 = shalt.err (!%p936_p5)
}
 0x52a   :  { %619 = dma.vmem_to_hbm [thread:$0]  %s617_s11, 128, %s1131_s9, [#allocation4]  }
 0x52b   :  { %946 = dma.done.wait [#allocation4], 128  }
 0x52c   :  { %947 = vsyncadd [#allocation4], 4294967168 }
 0x52d   :  { %623 = vsyncpa [#allocation3], 1 }
 0x52e   :  { %624 = vsyncpa [#allocation6], 1 }
 0x52f   :  { %625 = vsyncpa [#allocation9], 1 }
 0x530   :  { %626 = vsyncpa [#allocation4], 1 }

</bundles_post_ra>
